<compile_context>
chip_gen: v7x
topology: tpu7x:2x2x1
jax: 0.10.0
libtpu: 0.0.40
codegen_flags: <defaults>
</compile_context>

<pallas_src>
import numpy as np
import jax
import jax.numpy as jnp
from jax.experimental import pallas as pl
from jax.experimental.pallas import tpu as pltpu

# ----------------------------- static problem sizes -----------------------------
CI1, CO1, KH1, KW1 = 13, 6, 3, 3          # conv_transpose1 (padding=1, stride=1)
H_IN, W_IN = 8, 2
H1, W1 = 8, 2                             # conv_transpose1 output spatial

CI2, CO2, KH2, KW2 = 6, 3, 4, 2           # conv_transpose2 (padding=0, stride=1)
H2, W2 = H1 + KH2 - 1, W1 + KW2 - 1       # (11, 3)

FLAT_IN = CI1 * H_IN * W_IN               # 208
FLAT1 = CO1 * H1 * W1                     # 96
FLAT2 = CO2 * H2 * W2                     # 99

DROP_P = 0.5                              # F.dropout default (training=True)
DROP_SCALE = 1.0 / (1.0 - DROP_P)


# ----------------------------------- kernel -----------------------------------
def _fused_kernel(x_ref, m1_ref, b1_ref, m2_ref, b2_ref, keep_ref, out_ref):
    # conv_transpose1 folded into a single MXU matmul on the CHW-flattened input.
    v1 = jnp.dot(x_ref[...], m1_ref[...],
                 preferred_element_type=jnp.float32) + b1_ref[...]      # (1, 96)
    # v2..v6: elementwise hard-swish-like chain (VPU).
    v6 = v1 * jnp.clip(v1 + 3.0, 0.0, 6.0) * (1.0 / 6.0)
    # conv_transpose2 folded into a single MXU matmul.
    v7 = jnp.dot(v6, m2_ref[...],
                 preferred_element_type=jnp.float32) + b2_ref[...]      # (1, 99)
    # v8, v9 and dropout: keep mask in {0, 1}, kept values scaled by 1/(1-p).
    v9 = jnp.maximum(v7 - 5.0, -3.0)
    out_ref[...] = v9 * keep_ref[...] * DROP_SCALE


# ----------------------- one-time parameter preprocessing -----------------------
def _conv_transpose_operator(w, b, h_in, w_in, padding):
    """Dense operator for a stride-1 ConvTranspose2d on CHW-flattened tensors.

    w: (CI, CO, KH, KW) PyTorch ConvTranspose2d weight; returns (M, b_row) with
    M[(ci*h_in+ih)*w_in+iw, (co*h_out+oh)*w_out+ow] = w[ci, co, oh-ih+ph, ow-iw+pw].
    """
    w = np.asarray(w, np.float32)
    ci_dim, co_dim, kh, kw = w.shape
    ph, pw = padding
    h_out = h_in + kh - 1 - 2 * ph
    w_out = w_in + kw - 1 - 2 * pw
    m = np.zeros((ci_dim * h_in * w_in, co_dim * h_out * w_out), np.float32)
    for ci in range(ci_dim):
        for ih in range(h_in):
            for iw in range(w_in):
                row = (ci * h_in + ih) * w_in + iw
                for khi in range(kh):
                    oh = ih + khi - ph
                    if not (0 <= oh < h_out):
                        continue
                    for kwi in range(kw):
                        ow = iw + kwi - pw
                        if not (0 <= ow < w_out):
                            continue
                        for co in range(co_dim):
                            m[row, (co * h_out + oh) * w_out + ow] += w[ci, co, khi, kwi]
    b_row = np.repeat(np.asarray(b, np.float32), h_out * w_out)[None, :]
    return m, b_row


def prepare_params(w1, b1, w2, b2):
    """One-time: fold both transposed convs into dense operator matrices."""
    m1, b1_row = _conv_transpose_operator(w1, b1, H_IN, W_IN, (1, 1))   # (208, 96), (1, 96)
    m2, b2_row = _conv_transpose_operator(w2, b2, H1, W1, (0, 0))       # (96, 99),  (1, 99)
    return (jnp.asarray(m1), jnp.asarray(b1_row),
            jnp.asarray(m2), jnp.asarray(b2_row))


# --------------------------------- forward pass ---------------------------------
@jax.jit
def model_forward(x_nchw, m1, b1_row, m2, b2_row, dropout_key):
    """x_nchw: (1, 13, 8, 2) f32 -> (1, 3, 11, 3) f32."""
    x_flat = x_nchw.reshape(1, FLAT_IN)                                  # (1, 208)
    keep = jax.random.bernoulli(dropout_key, 1.0 - DROP_P,
                                (1, FLAT2)).astype(jnp.float32)          # (1, 99)
    out_flat = pl.pallas_call(
        _fused_kernel,
        out_shape=jax.ShapeDtypeStruct((1, FLAT2), jnp.float32),
        in_specs=[pl.BlockSpec(memory_space=pltpu.MemorySpace.VMEM)] * 6,
        out_specs=pl.BlockSpec(memory_space=pltpu.MemorySpace.VMEM),
    )(x_flat, m1, b1_row, m2, b2_row, keep)
    return out_flat.reshape(1, CO2, H2, W2)


# --------------------------- numpy reference (f64) ---------------------------
def _reference_pre_dropout(x_nchw, w1, b1, w2, b2):
    def convt(x_chw, w, b, padding):
        w = np.asarray(w, np.float64)
        ci_dim, co_dim, kh, kw = w.shape
        ph, pw = padding
        _, h_in, w_in = x_chw.shape
        h_out = h_in + kh - 1 - 2 * ph
        w_out = w_in + kw - 1 - 2 * pw
        out = np.zeros((co_dim, h_out, w_out), np.float64)
        for ci in range(ci_dim):
            for ih in range(h_in):
                for iw in range(w_in):
                    for khi in range(kh):
                        for kwi in range(kw):
                            oh, ow = ih + khi - ph, iw + kwi - pw
                            if 0 <= oh < h_out and 0 <= ow < w_out:
                                out[:, oh, ow] += x_chw[ci, ih, iw] * w[ci, :, khi, kwi]
        return out + np.asarray(b, np.float64)[:, None, None]

    v1 = convt(np.asarray(x_nchw[0], np.float64), w1, b1, (1, 1))
    v6 = v1 * np.clip(v1 + 3.0, 0.0, 6.0) / 6.0
    v7 = convt(v6, w2, b2, (0, 0))
    return np.maximum(v7 - 5.0, -3.0)


if __name__ == "__main__":
    key = jax.random.PRNGKey(0)
    kx, kw1, kb1, kw2, kb2, kdrop = jax.random.split(key, 6)

    x1 = jax.random.normal(kx, (1, CI1, H_IN, W_IN), dtype=jnp.float32)

    # deterministic, PyTorch-shaped parameters (uniform, roughly kaiming-scaled)
    bnd1 = 1.0 / (CI1 * KH1 * KW1) ** 0.5
    w1 = jax.random.uniform(kw1, (CI1, CO1, KH1, KW1), jnp.float32, -bnd1, bnd1)
    b1 = jax.random.uniform(kb1, (CO1,), jnp.float32, -bnd1, bnd1)
    bnd2 = 1.0 / (CI2 * KH2 * KW2) ** 0.5
    w2 = jax.random.uniform(kw2, (CI2, CO2, KH2, KW2), jnp.float32, -bnd2, bnd2)
    b2 = jax.random.uniform(kb2, (CO2,), jnp.float32, -bnd2, bnd2)

    params = prepare_params(w1, b1, w2, b2)            # one-time weight folding
    out = model_forward(x1, *params, kdrop)
    jax.block_until_ready(out)
    assert out.shape == (1, CO2, H2, W2), out.shape

    # self-check: every element must be ~0 (dropped) or ~2*v9 (kept, scaled).
    v9_ref = _reference_pre_dropout(np.asarray(x1), np.asarray(w1), np.asarray(b1),
                                    np.asarray(w2), np.asarray(b2))
    o = np.asarray(out[0], np.float64)
    ok = np.minimum(np.abs(o), np.abs(o - DROP_SCALE * v9_ref)) < 5e-2
    assert bool(ok.all()), "kernel output does not match reference"

    print("KERNEL_OK")
</pallas_src>

<mosaic_0001>
module attributes {stable_mosaic.version = 11 : i64} {
  func.func @_fused_kernel(%arg0: memref<1x208xf32, #tpu.memory_space<vmem>>, %arg1: memref<208x96xf32, #tpu.memory_space<vmem>>, %arg2: memref<1x96xf32, #tpu.memory_space<vmem>>, %arg3: memref<96x99xf32, #tpu.memory_space<vmem>>, %arg4: memref<1x99xf32, #tpu.memory_space<vmem>>, %arg5: memref<1x99xf32, #tpu.memory_space<vmem>>, %arg6: memref<1x99xf32, #tpu.memory_space<vmem>>) attributes {dimension_semantics = [], scalar_prefetch = 0 : i64, scratch_operands = 0 : i64, tpu.core_type = #tpu.core_type<tc>} {
    %c0 = arith.constant 0 : index
    %c0_0 = arith.constant 0 : index
    %0 = vector.load %arg0[%c0, %c0_0] : memref<1x208xf32, #tpu.memory_space<vmem>>, vector<1x208xf32>
    %c0_1 = arith.constant 0 : index
    %c0_2 = arith.constant 0 : index
    %1 = vector.load %arg1[%c0_1, %c0_2] : memref<208x96xf32, #tpu.memory_space<vmem>>, vector<208x96xf32>
    %cst = arith.constant dense<0.000000e+00> : vector<1x96xf32>
    %2 = tpu.matmul %0, %1, %cst {dimension_numbers = #tpu.dot_dimension_numbers<[1], [0], [0], [1], [0, 0, 1, 1], [], []>} : vector<1x208xf32>, vector<208x96xf32>, vector<1x96xf32> -> vector<1x96xf32>
    %c0_3 = arith.constant 0 : index
    %c0_4 = arith.constant 0 : index
    %3 = vector.load %arg2[%c0_3, %c0_4] : memref<1x96xf32, #tpu.memory_space<vmem>>, vector<1x96xf32>
    %4 = arith.addf %2, %3 : vector<1x96xf32>
    %cst_5 = arith.constant 3.000000e+00 : f32
    %5 = vector.broadcast %cst_5 : f32 to vector<1x96xf32>
    %6 = arith.addf %4, %5 : vector<1x96xf32>
    %cst_6 = arith.constant 0.000000e+00 : f32
    %cst_7 = arith.constant 6.000000e+00 : f32
    %7 = vector.broadcast %cst_6 : f32 to vector<1x96xf32>
    %8 = arith.maximumf %7, %6 : vector<1x96xf32>
    %9 = vector.broadcast %cst_7 : f32 to vector<1x96xf32>
    %10 = arith.minimumf %9, %8 : vector<1x96xf32>
    %11 = arith.mulf %4, %10 : vector<1x96xf32>
    %cst_8 = arith.constant 0.166666672 : f32
    %12 = vector.broadcast %cst_8 : f32 to vector<1x96xf32>
    %13 = arith.mulf %11, %12 : vector<1x96xf32>
    %c0_9 = arith.constant 0 : index
    %c0_10 = arith.constant 0 : index
    %14 = vector.load %arg3[%c0_9, %c0_10] : memref<96x99xf32, #tpu.memory_space<vmem>>, vector<96x99xf32>
    %cst_11 = arith.constant dense<0.000000e+00> : vector<1x99xf32>
    %15 = tpu.matmul %13, %14, %cst_11 {dimension_numbers = #tpu.dot_dimension_numbers<[1], [0], [0], [1], [0, 0, 1, 1], [], []>} : vector<1x96xf32>, vector<96x99xf32>, vector<1x99xf32> -> vector<1x99xf32>
    %c0_12 = arith.constant 0 : index
    %c0_13 = arith.constant 0 : index
    %16 = vector.load %arg4[%c0_12, %c0_13] : memref<1x99xf32, #tpu.memory_space<vmem>>, vector<1x99xf32>
    %17 = arith.addf %15, %16 : vector<1x99xf32>
    %cst_14 = arith.constant 5.000000e+00 : f32
    %18 = vector.broadcast %cst_14 : f32 to vector<1x99xf32>
    %19 = arith.subf %17, %18 : vector<1x99xf32>
    %cst_15 = arith.constant -3.000000e+00 : f32
    %20 = vector.broadcast %cst_15 : f32 to vector<1x99xf32>
    %21 = arith.maximumf %19, %20 : vector<1x99xf32>
    %c0_16 = arith.constant 0 : index
    %c0_17 = arith.constant 0 : index
    %22 = vector.load %arg5[%c0_16, %c0_17] : memref<1x99xf32, #tpu.memory_space<vmem>>, vector<1x99xf32>
    %23 = arith.mulf %21, %22 : vector<1x99xf32>
    %cst_18 = arith.constant 2.000000e+00 : f32
    %24 = vector.broadcast %cst_18 : f32 to vector<1x99xf32>
    %25 = arith.mulf %23, %24 : vector<1x99xf32>
    %c0_19 = arith.constant 0 : index
    %c0_20 = arith.constant 0 : index
    %26 = vector.load %arg6[%c0_19, %c0_20] : memref<1x99xf32, #tpu.memory_space<vmem>>, vector<1x99xf32>
    tpu.vector_store %arg6[%c0_19, %c0_20], %25 {strides = array<i32>} : memref<1x99xf32, #tpu.memory_space<vmem>>, vector<1x99xf32>,
    return
  }
}

</mosaic_0001>

<bundles_post_ra>
// kernel: model_forward.1
= control target key start
LH: loop header
LB: loop body
LE: loop exit
PB: predicated region body
PF: predicated region fallthrough
CT: control target
= control target key end

     0   :  { %v52_v0 = vlaneseq  ;;  %v340_v1 = vmov 0.0|0.0   ;;  %vm61_vm0 = vcmask 654336   ;;  %vm341_vm1 = vmmov 0   ;;  %s534_s1 = inlined_call_operand.vmem [shape: f32[208,96], index: 1, kind: input, shape index: {}]   ;;  %s535_s0 = inlined_call_operand.vmem [shape: f32[1,208], index: 0, kind: input, shape index: {}]   ;;  %s536_s3 = inlined_call_operand.vmem [shape: f32[96,99], index: 3, kind: input, shape index: {}]   ;;  %s537_s2 = inlined_call_operand.vmem [shape: f32[1,96], index: 2, kind: input, shape index: {}]   ;;  %s538_s4 = inlined_call_operand.vmem [shape: f32[1,99], index: 4, kind: input, shape index: {}]   ;;  %s539_s5 = inlined_call_operand.vmem [shape: f32[1,99], index: 5, kind: input, shape index: {}]   ;;  %s540_s6 = inlined_call_operand.vmem [shape: f32[1,99], index: 6, kind: output, shape index: {}]  }
   0x1   :  { %280 = vmatprep.subr.bf16.mxu0 %v340_v1  ;;  %v24_v2 = vld [vmem:[%s534_s1] sm:$0xff]  ;;  %v25_v3 = vld [vmem:[%s534_s1 + $0x8] sm:$0xff]  ;;  %v26_v4 = vld [vmem:[%s534_s1 + $0x10] sm:$0xff]  ;;  %319 = vmatprep.subr.bf16.mxu1 %v340_v1  ;;  %vm152_vm2 = vcmask 785408   ;;  %vm231_vm3 = vcmask 802816  }
   0x2   :  { %v281_v5 = vpack.c.bf16 %v25_v3, %v24_v2  ;;  %v27_v6 = vld [vmem:[%s534_s1 + $0x18] sm:$0xff]  ;;  %v392_v7 = vshrl.u32 %v52_v0, 7  ;;  %v28_v9 = vld [vmem:[%s534_s1 + $0x20] sm:$0xff]  ;;  %v29_v10 = vld [vmem:[%s534_s1 + $0x28] sm:$0xff]  ;;  %v342_v2 = vmov 0.0  }
   0x3   :  { %v284_v8 = vpack.c.bf16 %v27_v6, %v26_v4  ;;  %v287_v12 = vpack.c.bf16 %v29_v10, %v28_v9  ;;  %v30_v13 = vld [vmem:[%s534_s1 + $0x30] sm:$0xff]  ;;  %v31_v14 = vld [vmem:[%s534_s1 + $0x38] sm:$0xff]  ;;  %v412_v15 = vld [vmem:[%s535_s0] sm:$0x3]  ;;  %277 = vmatprep.mubr.msk.f32.mxu1 %vm341_vm1, %v342_v2 }
   0x4   :  { %282 = vmatpush1.bf16.msra.mxu0 %v281_v5  ;;  %v58_v11 = vsub.s32 1, %v392_v7  ;;  %v139_v17 = vld [vmem:[%s536_s3] sm:$0xff]  ;;  %v140_v18 = vld [vmem:[%s536_s3 + $0x8] sm:$0xff]  ;;  %v141_v19 = vld [vmem:[%s536_s3 + $0x10] sm:$0xff]  ;;  %v290_v22 = vpack.c.bf16 %v31_v14, %v30_v13  ;;  %v54_v53 = vsub.s32 0, %v392_v7 }
   0x5   :  { %283 = vmatprep.subr.bf16.mxu0 %v340_v1  ;;  %v320_v20 = vpack.c.bf16 %v140_v18, %v139_v17  ;;  %v142_v21 = vld [vmem:[%s536_s3 + $0x18] sm:$0xff]  ;;  %v32_v23 = vld [vmem:[%s534_s1 + $0x40] sm:$0xff]  ;;  %v33_v24 = vld [vmem:[%s534_s1 + $0x48] sm:$0xff] }
   0x6   :  { %v59_v16 = vrot.slane %v412_v15, %v58_v11  ;;  %v323_v25 = vpack.c.bf16 %v142_v21, %v141_v19  ;;  %v143_v26 = vld [vmem:[%s536_s3 + $0x20] sm:$0xff]  ;;  %v144_v27 = vld [vmem:[%s536_s3 + $0x28] sm:$0xff]  ;;  %v293_v28 = vpack.c.bf16 %v33_v24, %v32_v23  ;;  %v34_v29 = vld [vmem:[%s534_s1 + $0x50] sm:$0xff]  ;;  %v55_v55 = vrot.slane %v412_v15, %v54_v53 }
   0x7   :  { %321 = vmatpush3.bf16.msra.mxu1 %v320_v20  ;;  %v35_v30 = vld [vmem:[%s534_s1 + $0x58] sm:$0xff]  ;;  %v326_v31 = vpack.c.bf16 %v144_v27, %v143_v26  ;;  %v36_v33 = vld [vmem:[%s534_s1 + $0x60] sm:$0xff]  ;;  %v37_v34 = vld [vmem:[%s534_s1 + $0x68] sm:$0xff] }
   0x8   :  { %285 = vmatpush1.bf16.msra.mxu0 %v284_v8  ;;  %237 = vmatprep.mubr.msk.f32.mxu0 %vm61_vm0, %v59_v16  ;;  %v296_v32 = vpack.c.bf16 %v35_v30, %v34_v29  ;;  %v299_v35 = vpack.c.bf16 %v37_v34, %v36_v33  ;;  %v38_v36 = vld [vmem:[%s534_s1 + $0x70] sm:$0xff]  ;;  %v39_v37 = vld [vmem:[%s534_s1 + $0x78] sm:$0xff]  ;;  %v40_v39 = vld [vmem:[%s534_s1 + $0x80] sm:$0xff] }
   0x9   :  { %286 = vmatprep.subr.bf16.mxu0 %v340_v1  ;;  %322 = vmatprep.subr.bf16.mxu1 %v340_v1  ;;  %v302_v38 = vpack.c.bf16 %v39_v37, %v38_v36  ;;  %v41_v40 = vld [vmem:[%s534_s1 + $0x88] sm:$0xff]  ;;  %v42_v42 = vld [vmem:[%s534_s1 + $0x90] sm:$0xff]  ;;  %v43_v43 = vld [vmem:[%s534_s1 + $0x98] sm:$0xff] }
   0xa   :  { %v305_v41 = vpack.c.bf16 %v41_v40, %v40_v39  ;;  %v308_v44 = vpack.c.bf16 %v43_v43, %v42_v42  ;;  %v44_v45 = vld [vmem:[%s534_s1 + $0xa0] sm:$0xff]  ;;  %v45_v46 = vld [vmem:[%s534_s1 + $0xa8] sm:$0xff]  ;;  %v46_v48 = vld [vmem:[%s534_s1 + $0xb0] sm:$0xff] }
   0xb   :  { %324 = vmatpush3.bf16.msra.mxu1 %v323_v25  ;;  %v311_v47 = vpack.c.bf16 %v45_v46, %v44_v45  ;;  %v47_v49 = vld [vmem:[%s534_s1 + $0xb8] sm:$0xff]  ;;  %v48_v51 = vld [vmem:[%s534_s1 + $0xc0] sm:$0xff]  ;;  %v49_v52 = vld [vmem:[%s534_s1 + $0xc8] sm:$0xff] }
   0xc   :  { %288 = vmatpush1.bf16.msra.mxu0 %v287_v12  ;;  %325 = vmatprep.subr.bf16.mxu1 %v340_v1  ;;  %v314_v50 = vpack.c.bf16 %v47_v49, %v46_v48  ;;  %v317_v54 = vpack.c.bf16 %v49_v52, %v48_v51  ;;  %v145_v56 = vld [vmem:[%s536_s3 + $0x30] sm:$0xff]  ;;  %v146_v57 = vld [vmem:[%s536_s3 + $0x38] sm:$0xff]  ;;  %v147_v59 = vld [vmem:[%s536_s3 + $0x40] sm:$0xff] }
   0xd   :  { %289 = vmatprep.subr.bf16.mxu0 %v340_v1  ;;  %v329_v58 = vpack.c.bf16 %v146_v57, %v145_v56  ;;  %v148_v60 = vld [vmem:[%s536_s3 + $0x48] sm:$0xff]  ;;  %v149_v62 = vld [vmem:[%s536_s3 + $0x50] sm:$0xff]  ;;  %v150_v63 = vld [vmem:[%s536_s3 + $0x58] sm:$0xff] }
   0xe   :  { %v332_v61 = vpack.c.bf16 %v148_v60, %v147_v59  ;;  %v335_v0 = vpack.c.bf16 %v150_v63, %v149_v62  ;;  %v50_v3 = vld [vmem:[%s537_s2] sm:$0x1] }
   0xf   :  { %327 = vmatpush3.bf16.msra.mxu1 %v326_v31  ;;  %v151_v11 = vld [vmem:[%s538_s4] sm:$0x1] }
  0x10   :  { %291 = vmatpush1.bf16.msra.mxu0 %v290_v22  ;;  %328 = vmatprep.subr.bf16.mxu1 %v340_v1  ;;  %v228_v16 = vld [vmem:[%s539_s5] sm:$0x1] }
  0x11   :  { %292 = vmatprep.subr.bf16.mxu0 %v340_v1 }
  0x13   :  { %330 = vmatpush3.bf16.msra.mxu1 %v329_v58 }
  0x14   :  { %294 = vmatpush1.bf16.msra.mxu0 %v293_v28  ;;  %331 = vmatprep.subr.bf16.mxu1 %v340_v1 }
  0x15   :  { %295 = vmatprep.subr.bf16.mxu0 %v340_v1 }
  0x17   :  { %333 = vmatpush3.bf16.msra.mxu1 %v332_v61 }
  0x18   :  { %297 = vmatpush1.bf16.msra.mxu0 %v296_v32  ;;  %334 = vmatprep.subr.bf16.mxu1 %v340_v1 }
  0x19   :  { %298 = vmatprep.subr.bf16.mxu0 %v340_v1 }
  0x1b   :  { %336 = vmatpush3.bf16.msra.mxu1 %v335_v0 }
  0x1c   :  { %300 = vmatpush1.bf16.msra.mxu0 %v299_v35 }
  0x1d   :  { %301 = vmatprep.subr.bf16.mxu0 %v340_v1 }
  0x20   :  { %303 = vmatpush1.bf16.msra.mxu0 %v302_v38 }
  0x21   :  { %304 = vmatprep.subr.bf16.mxu0 %v340_v1 }
  0x24   :  { %306 = vmatpush1.bf16.msra.mxu0 %v305_v41 }
  0x25   :  { %307 = vmatprep.subr.bf16.mxu0 %v340_v1 }
  0x28   :  { %309 = vmatpush1.bf16.msra.mxu0 %v308_v44 }
  0x29   :  { %310 = vmatprep.subr.bf16.mxu0 %v340_v1 }
  0x2c   :  { %312 = vmatpush1.bf16.msra.mxu0 %v311_v47 }
  0x2d   :  { %313 = vmatprep.subr.bf16.mxu0 %v340_v1 }
  0x30   :  { %315 = vmatpush1.bf16.msra.mxu0 %v314_v50 }
  0x31   :  { %316 = vmatprep.subr.bf16.mxu0 %v340_v1 }
  0x34   :  { %318 = vmatpush1.bf16.msra.mxu0 %v317_v54 }
  0x37   :  { %129 = vmatmul.mubr.f32.vlgmr.msra.gmra.mrb[0].mxu0 %v55_v55 }
 0x10a   :  { %v130_v4 = vpop.f32.mrb[0].mxu0 }
 0x10b   :  { %v131_v5 = vadd.f32 %v130_v4, %v50_v3  ;;  %v132_v1 = vpop.f32.mrb[1].mxu0 }
 0x10d   :  { %v134_v6 = vadd.f32 3.0, %v131_v5 }
 0x10f   :  { %v135_v7 = vmax.f32 %v134_v6, 0.0 }
 0x111   :  { %v136_v8 = vmin.f32 %v135_v7, 6.0 }
 0x113   :  { %v137_v9 = vmul.f32 %v136_v8, %v131_v5 }
 0x115   :  { %v138_v10 = vmul.f32 0.16666667, %v137_v9 }
 0x117   :  { %278 = vmatmul.mubr.msk.f32.vlgmr.msra.gmra.mrb[0].mxu1 %vm152_vm2, %v138_v10 }
 0x1ea   :  { %v222_v12 = vpop.f32.mrb[0].mxu1 }
 0x1eb   :  { %v223_v13 = vadd.f32 %v222_v12, %v151_v11  ;;  %v279_v14 = vpop.f32.mrb[1].mxu1 }
 0x1ed   :  { %v239_v15 = vadd.f32 -5.0, %v223_v13 }
 0x1ef   :  { %v227_v17 = vmax.f32 %v239_v15, -3.0 }
 0x1f1   :  { %v229_v18 = vmul.f32 %v228_v16, %v227_v17 }
 0x1f3   :  { %v230_v19 = vmul.f32 2.0, %v229_v18 }
 0x1f5   :  { %232 = vst.msk [vmem:[%s540_s6] sm:$0x1] %vm231_vm3, %v230_v19 }

</bundles_post_ra>
